<compile_context>
chip_gen: v6e
topology: v6e:2x2x1
jax: 0.10.0
libtpu: 0.0.40
codegen_flags: <defaults>
</compile_context>

<pallas_src>
import functools
import math

import jax
import jax.numpy as jnp
import numpy as np
from jax import lax
from jax.experimental import pallas as pl
from jax.experimental.pallas import tpu as pltpu


# ---------------------------------------------------------------------------
# Kernels
# ---------------------------------------------------------------------------
def _fused_ffn_kernel(x_ref, w1_ref, b1_ref, w2_ref, b2_ref, o_ref, *, d_hidden):
    """Block-diagonal dual FFN (v6e/v7x): 2 wide matmuls, lane-selected act."""
    x = x_ref[...].astype(w1_ref.dtype)                         # (nt, 2D) bf16
    h = jnp.dot(x, w1_ref[...], preferred_element_type=jnp.float32)
    h = h + b1_ref[...]                                         # (1, 2*DH) f32 bias
    lane = lax.broadcasted_iota(jnp.int32, h.shape, 1)
    # lanes [0, d_hidden)   -> amplitude hidden -> ReLU
    # lanes [d_hidden, 2dh) -> phase hidden     -> Tanh   (pad lanes stay 0)
    h = jnp.where(lane < d_hidden, jnp.maximum(h, 0.0), jnp.tanh(h))
    out = jnp.dot(h.astype(w2_ref.dtype), w2_ref[...],
                  preferred_element_type=jnp.float32)
    out = out + b2_ref[...]                                     # (1, 2D)
    o_ref[...] = out.astype(o_ref.dtype)                        # already [amp|phase]


def _dual_ffn_kernel(x_ref, w1a_ref, b1a_ref, w2a_ref, b2a_ref,
                     w1p_ref, b1p_ref, w2p_ref, b2p_ref, o_ref, *, d_model):
    """Per-channel dual FFN (v5e path): 4 matmuls padded to 128-wide hidden."""
    x = x_ref[...]                                              # (nt, 2D) f32
    va = x[:, :d_model].astype(w1a_ref.dtype)
    vp = x[:, d_model:].astype(w1p_ref.dtype)

    # amplitude: Linear -> ReLU -> Linear  (f32 accumulate + f32 epilogue)
    ha = jnp.dot(va, w1a_ref[...], preferred_element_type=jnp.float32) + b1a_ref[...]
    ha = jnp.maximum(ha, 0.0)
    oa = jnp.dot(ha.astype(w2a_ref.dtype), w2a_ref[...],
                 preferred_element_type=jnp.float32) + b2a_ref[...]

    # phase: Linear -> Tanh -> Linear (tanh on EUP, f32)
    hp = jnp.dot(vp, w1p_ref[...], preferred_element_type=jnp.float32) + b1p_ref[...]
    hp = jnp.tanh(hp)
    op = jnp.dot(hp.astype(w2p_ref.dtype), w2p_ref[...],
                 preferred_element_type=jnp.float32) + b2p_ref[...]

    o_ref[...] = jnp.concatenate([oa, op], axis=-1).astype(o_ref.dtype)


# ---------------------------------------------------------------------------
# Wrapper
# ---------------------------------------------------------------------------
def _round_up(x, m):
    return ((x + m - 1) // m) * m


def _choose_row_tile(n_rows):
    # Big tiles amortize the ~0.35us per-grid-step overhead; the cap keeps the
    # double-buffered VMEM footprint a few MiB (fine even on v7x's 64 MiB).
    if n_rows >= 2048:
        return 1024
    if n_rows >= 32:
        # split small problems in two so both v7x TensorCores get a grid step
        return _round_up((n_rows + 1) // 2, 16)
    return _round_up(max(n_rows, 1), 16)


def _default_fuse_channels():
    # 256-wide block-diagonal fusion pays off on v6e/v7x (256x256 MXU);
    # v5e/v4/... have 128-wide MXUs where it only adds zero-FLOP passes.
    try:
        kind = jax.devices()[0].device_kind.lower()
    except Exception:
        return True
    return not any(t in kind for t in ("v2", "v3", "v4", "v5"))


def positionwise_feed_forward(q, k, v, params, *, fuse_channels=None,
                              matmul_dtype=jnp.bfloat16, out_dtype=jnp.bfloat16):
    """Mirrors PositionwiseFeedForward.forward: returns (q, k, v_ffn)."""
    B, H, S, C, D = v.shape                    # C >= 2 (amp/phase), D == 100
    assert C >= 2, "v must carry at least amplitude and phase channels"
    if C != 2:                                 # extra channels dropped (matches torch 0:1/1:2)
        v = v[..., :2, :]

    if fuse_channels is None:
        fuse_channels = _default_fuse_channels()

    n_rows = B * H * S
    D2 = 2 * D
    DH = max(_round_up(D, 128), 128)           # lane-dense hidden width per channel
    f32 = jnp.float32

    nt = _choose_row_tile(n_rows)
    n_pad = _round_up(n_rows, nt)

    # Free reshape: channel slice / cast happen inside the kernel.
    x = v.reshape(n_rows, D2)
    if n_pad != n_rows:                        # rare fallback; tail rows are discarded
        x = jnp.pad(x, ((0, n_pad - n_rows), (0, 0)))

    # ---- one-time weight packing (tiny; weights stay VMEM-resident) ----
    if fuse_channels:
        # Block-diagonal layer 1: (2D, 2*DH); columns [0:D]=amp, [DH:DH+D]=phase.
        w1 = jnp.zeros((D2, 2 * DH), f32)
        w1 = w1.at[:D, :D].set(params["W1a"]).at[D:, DH:DH + D].set(params["W1p"])
        b1 = jnp.zeros((1, 2 * DH), f32)
        b1 = b1.at[0, :D].set(params["b1a"]).at[0, DH:DH + D].set(params["b1p"])
        # Layer 2 packs its columns so the result is already [amp | phase] (2D wide).
        w2 = jnp.zeros((2 * DH, D2), f32)
        w2 = w2.at[:D, :D].set(params["W2a"]).at[DH:DH + D, D:].set(params["W2p"])
        b2 = jnp.concatenate([params["b2a"], params["b2p"]]).reshape(1, D2).astype(f32)

        weight_args = (w1.astype(matmul_dtype), b1, w2.astype(matmul_dtype), b2)
        w_specs = [pl.BlockSpec((D2, 2 * DH), lambda i: (0, 0)),
                   pl.BlockSpec((1, 2 * DH), lambda i: (0, 0)),
                   pl.BlockSpec((2 * DH, D2), lambda i: (0, 0)),
                   pl.BlockSpec((1, D2), lambda i: (0, 0))]
        kernel = functools.partial(_fused_ffn_kernel, d_hidden=DH)
    else:
        pad_n = lambda n: jnp.pad(params[n], ((0, 0), (0, DH - D)))          # (D, DH)
        pad_k = lambda n: jnp.pad(params[n], ((0, DH - D), (0, 0)))          # (DH, D)
        pad_b = lambda n: jnp.pad(params[n], (0, DH - D)).reshape(1, DH).astype(f32)
        row_b = lambda n: params[n].reshape(1, D).astype(f32)
        weight_args = (pad_n("W1a").astype(matmul_dtype), pad_b("b1a"),
                       pad_k("W2a").astype(matmul_dtype), row_b("b2a"),
                       pad_n("W1p").astype(matmul_dtype), pad_b("b1p"),
                       pad_k("W2p").astype(matmul_dtype), row_b("b2p"))
        w_specs = [pl.BlockSpec((D, DH), lambda i: (0, 0)),
                   pl.BlockSpec((1, DH), lambda i: (0, 0)),
                   pl.BlockSpec((DH, D), lambda i: (0, 0)),
                   pl.BlockSpec((1, D), lambda i: (0, 0))] * 2
        kernel = functools.partial(_dual_ffn_kernel, d_model=D)

    grid = n_pad // nt
    row_spec = pl.BlockSpec((nt, D2), lambda i: (i, 0))

    out = pl.pallas_call(
        kernel,
        out_shape=jax.ShapeDtypeStruct((n_pad, D2), out_dtype),
        grid_spec=pltpu.PrefetchScalarGridSpec(
            num_scalar_prefetch=0,
            grid=(grid,),
            in_specs=[row_spec] + w_specs,
            out_specs=row_spec),
        compiler_params=pltpu.CompilerParams(
            dimension_semantics=("parallel",),
            vmem_limit_bytes=32 * 1024 * 1024),
    )(x, *weight_args)

    if n_pad != n_rows:
        out = out[:n_rows]
    v_ffn = out.reshape(B, H, S, 2, D)         # free: [amp | phase] == cat(dim=3)
    return q, k, v_ffn


# ---------------------------------------------------------------------------
# Pure-JAX reference (same bf16 operand rounding as the kernel)
# ---------------------------------------------------------------------------
def _reference(q, k, v, params):
    cast = lambda x: x.astype(jnp.bfloat16).astype(jnp.float32)
    va = cast(v[..., 0, :])
    vp = cast(v[..., 1, :])
    W = lambda n: cast(params[n])
    ha = jnp.maximum(va @ W("W1a") + params["b1a"], 0.0)
    oa = cast(ha) @ W("W2a") + params["b2a"]
    hp = jnp.tanh(vp @ W("W1p") + params["b1p"])
    op = cast(hp) @ W("W2p") + params["b2p"]
    return q, k, jnp.stack([oa, op], axis=3)


def _init_params(key, d_model=100):
    ks = jax.random.split(key, 8)
    scale = 1.0 / math.sqrt(d_model)
    g = lambda kk: jax.random.normal(kk, (d_model, d_model), jnp.float32) * scale
    bz = lambda kk: jax.random.normal(kk, (d_model,), jnp.float32) * 0.1
    # Weights stored as (in, out) == W_torch.T so the kernel computes x @ W + b.
    return {
        "W1a": g(ks[0]), "b1a": bz(ks[1]),
        "W2a": g(ks[2]), "b2a": bz(ks[3]),
        "W1p": g(ks[4]), "b1p": bz(ks[5]),
        "W2p": g(ks[6]), "b2p": bz(ks[7]),
    }


if __name__ == "__main__":
    # v: [batch, heads, seq, 2 (amplitude/phase), d_model=100]
    B, H, S, C, D = 2, 4, 8, 2, 100

    key = jax.random.PRNGKey(0)
    kq, kk_, kv, kp = jax.random.split(key, 4)
    q = jax.random.normal(kq, (B, H, S, C, D), jnp.float32)
    k = jax.random.normal(kk_, (B, H, S, C, D), jnp.float32)
    v = jax.random.normal(kv, (B, H, S, C, D), jnp.float32)
    params = _init_params(kp, D)

    _, _, r_v = _reference(q, k, v, params)
    r_v = np.asarray(r_v)

    # Exercise the auto-dispatched path plus both explicit variants
    # (256-wide block-diagonal fusion and 128-padded per-channel matmuls).
    for fuse in (None, True, False):
        fwd = jax.jit(functools.partial(positionwise_feed_forward, fuse_channels=fuse))
        q_o, k_o, v_ffn = fwd(q, k, v, params)
        jax.block_until_ready(v_ffn)

        assert v_ffn.shape == (B, H, S, 2, D)
        np.testing.assert_array_equal(np.asarray(q_o), np.asarray(q))
        np.testing.assert_array_equal(np.asarray(k_o), np.asarray(k))
        np.testing.assert_allclose(np.asarray(v_ffn.astype(jnp.float32)), r_v,
                                   rtol=2e-2, atol=2e-2)

    print("KERNEL_OK")
</pallas_src>

<mosaic_0001>
module attributes {stable_mosaic.version = 11 : i64} {
  func.func @_fused_ffn_kernel(%arg0: i32, %arg1: memref<32x200xf32, #tpu.memory_space<vmem>>, %arg2: memref<200x256xbf16, #tpu.memory_space<vmem>>, %arg3: memref<1x256xf32, #tpu.memory_space<vmem>>, %arg4: memref<256x200xbf16, #tpu.memory_space<vmem>>, %arg5: memref<1x200xf32, #tpu.memory_space<vmem>>, %arg6: memref<32x200xbf16, #tpu.memory_space<vmem>>) attributes {dimension_semantics = [#tpu.dimension_semantics<parallel>], iteration_bounds = array<i64: 2>, scalar_prefetch = 0 : i64, scratch_operands = 0 : i64, tpu.core_type = #tpu.core_type<tc>, window_params = [{transform_indices = @transform_0, window_bounds = array<i64: 32, 200>}, {pipeline_mode = #tpu.pipeline_mode<synchronous>, transform_indices = @transform_1, window_bounds = array<i64: 200, 256>}, {pipeline_mode = #tpu.pipeline_mode<synchronous>, transform_indices = @transform_2, window_bounds = array<i64: 1, 256>}, {pipeline_mode = #tpu.pipeline_mode<synchronous>, transform_indices = @transform_3, window_bounds = array<i64: 256, 200>}, {pipeline_mode = #tpu.pipeline_mode<synchronous>, transform_indices = @transform_4, window_bounds = array<i64: 1, 200>}, {transform_indices = @transform_5, window_bounds = array<i64: 32, 200>}]} {
    %c0 = arith.constant 0 : index
    %c0_0 = arith.constant 0 : index
    %0 = vector.load %arg1[%c0, %c0_0] : memref<32x200xf32, #tpu.memory_space<vmem>>, vector<32x200xf32>
    %1 = arith.truncf %0 : vector<32x200xf32> to vector<32x200xbf16>
    %c0_1 = arith.constant 0 : index
    %c0_2 = arith.constant 0 : index
    %2 = vector.load %arg2[%c0_1, %c0_2] : memref<200x256xbf16, #tpu.memory_space<vmem>>, vector<200x256xbf16>
    %cst = arith.constant dense<0.000000e+00> : vector<32x256xf32>
    %3 = tpu.matmul %1, %2, %cst {dimension_numbers = #tpu.dot_dimension_numbers<[1], [0], [0], [1], [0, 0, 1, 1], [], []>} : vector<32x200xbf16>, vector<200x256xbf16>, vector<32x256xf32> -> vector<32x256xf32>
    %c0_3 = arith.constant 0 : index
    %c0_4 = arith.constant 0 : index
    %4 = vector.load %arg3[%c0_3, %c0_4] : memref<1x256xf32, #tpu.memory_space<vmem>>, vector<1x256xf32>
    %5 = vector.broadcast %4 : vector<1x256xf32> to vector<32x256xf32>
    %6 = arith.addf %3, %5 : vector<32x256xf32>
    %7 = tpu.iota {dimensions = array<i32: 1>} : vector<32x256xi32>
    %c128_i32 = arith.constant 128 : i32
    %8 = vector.broadcast %c128_i32 : i32 to vector<32x256xi32>
    %9 = arith.cmpi slt, %7, %8 : vector<32x256xi32>
    %cst_5 = arith.constant 0.000000e+00 : f32
    %10 = vector.broadcast %cst_5 : f32 to vector<32x256xf32>
    %11 = arith.maximumf %6, %10 : vector<32x256xf32>
    %12 = math.tanh %6 : vector<32x256xf32>
    %13 = arith.select %9, %11, %12 : vector<32x256xi1>, vector<32x256xf32>
    %14 = arith.truncf %13 : vector<32x256xf32> to vector<32x256xbf16>
    %c0_6 = arith.constant 0 : index
    %c0_7 = arith.constant 0 : index
    %15 = vector.load %arg4[%c0_6, %c0_7] : memref<256x200xbf16, #tpu.memory_space<vmem>>, vector<256x200xbf16>
    %cst_8 = arith.constant dense<0.000000e+00> : vector<32x200xf32>
    %16 = tpu.matmul %14, %15, %cst_8 {dimension_numbers = #tpu.dot_dimension_numbers<[1], [0], [0], [1], [0, 0, 1, 1], [], []>} : vector<32x256xbf16>, vector<256x200xbf16>, vector<32x200xf32> -> vector<32x200xf32>
    %c0_9 = arith.constant 0 : index
    %c0_10 = arith.constant 0 : index
    %17 = vector.load %arg5[%c0_9, %c0_10] : memref<1x200xf32, #tpu.memory_space<vmem>>, vector<1x200xf32>
    %18 = vector.broadcast %17 : vector<1x200xf32> to vector<32x200xf32>
    %19 = arith.addf %16, %18 : vector<32x200xf32>
    %20 = arith.truncf %19 : vector<32x200xf32> to vector<32x200xbf16>
    %c0_11 = arith.constant 0 : index
    %c0_12 = arith.constant 0 : index
    %21 = vector.load %arg6[%c0_11, %c0_12] : memref<32x200xbf16, #tpu.memory_space<vmem>>, vector<32x200xbf16>
    tpu.vector_store %arg6[%c0_11, %c0_12], %20 {strides = array<i32>} : memref<32x200xbf16, #tpu.memory_space<vmem>>, vector<32x200xbf16>,
    return
  }
  func.func @transform_0(%arg0: i32) -> (i32, i32) {
    %c0_i32 = arith.constant 0 : i32
    %c0_i32_0 = arith.constant 0 : i32
    return %arg0, %c0_i32 : i32, i32
  }
  func.func @transform_1(%arg0: i32) -> (i32, i32) {
    %c0_i32 = arith.constant 0 : i32
    %c0_i32_0 = arith.constant 0 : i32
    %c0_i32_1 = arith.constant 0 : i32
    return %c0_i32, %c0_i32_0 : i32, i32
  }
  func.func @transform_2(%arg0: i32) -> (i32, i32) {
    %c0_i32 = arith.constant 0 : i32
    %c0_i32_0 = arith.constant 0 : i32
    %c0_i32_1 = arith.constant 0 : i32
    return %c0_i32, %c0_i32_0 : i32, i32
  }
  func.func @transform_3(%arg0: i32) -> (i32, i32) {
    %c0_i32 = arith.constant 0 : i32
    %c0_i32_0 = arith.constant 0 : i32
    %c0_i32_1 = arith.constant 0 : i32
    return %c0_i32, %c0_i32_0 : i32, i32
  }
  func.func @transform_4(%arg0: i32) -> (i32, i32) {
    %c0_i32 = arith.constant 0 : i32
    %c0_i32_0 = arith.constant 0 : i32
    %c0_i32_1 = arith.constant 0 : i32
    return %c0_i32, %c0_i32_0 : i32, i32
  }
  func.func @transform_5(%arg0: i32) -> (i32, i32) {
    %c0_i32 = arith.constant 0 : i32
    %c0_i32_0 = arith.constant 0 : i32
    return %arg0, %c0_i32 : i32, i32
  }
}

</mosaic_0001>

<bundles_post_ra>
// kernel: positionwise_feed_forward.1
= control target key start
LH: loop header
LB: loop body
LE: loop exit
PB: predicated region body
PF: predicated region fallthrough
CT: control target
= control target key end

     0   :  { %s1077_s18 = smov 0   ;;  %s1302_s0 = inlined_call_operand.vmem [shape: f32[64,200], index: 0, kind: input, shape index: {}]   ;;  %s1303_s1 = inlined_call_operand.vmem [shape: bf16[200,256], index: 1, kind: input, shape index: {}]   ;;  %s1304_s2 = inlined_call_operand.vmem [shape: f32[1,256], index: 2, kind: input, shape index: {}]   ;;  %s1305_s3 = inlined_call_operand.vmem [shape: bf16[256,200], index: 3, kind: input, shape index: {}]   ;;  %s1306_s4 = inlined_call_operand.vmem [shape: f32[1,200], index: 4, kind: input, shape index: {}]   ;;  %s1307_s5 = inlined_call_operand.vmem [shape: bf16[64,200], index: 5, kind: output, shape index: {}]  }
   0x1 LB: > { %s853_s19 = sadd.s32 4294967295, %s1045_s18   ;;  %p857_p0 = scmp.ge.s32.totalorder %s1045_s18, 1  ;;  %s1045_s18 = sphi %s1077_s18, %s15_s18  }
   0x2   : > { %p189_p1 = scmp.lt.s32.totalorder %s1045_s18, 3 }
   0x4   : > { %p190_p2 = pnand %p857_p0, %p189_p1 }
   0x5   : > { %s858_s24 = sshll.u32 (!%p190_p2), %s853_s19, 2 }
   0x6   : > { %193 = sbr.rel (%p190_p2) target bundleno = 494 (0x1ee), region = 40  ;;  %p220_p3 = scmp.lt.s32.totalorder (!%p190_p2), %s858_s24, 7 }
   0xb   : > { %v945_v0 = vld [vmem:[%s1303_s1 + $0x74] ss:$8 sps:$4 sm:$0xff]   ;;  %v947_v1 = vld [vmem:[%s1303_s1 + $0x70] ss:$8 sps:$4 sm:$0xff]   ;;  %v948_v2 = vld [vmem:[%s1303_s1 + $0x64] ss:$8 sps:$4 sm:$0xff]  }
   0xc   : > { %422 = vmatprep.subr.bf16.mxu0 %v945_v0  ;;  %v950_v3 = vld [vmem:[%s1303_s1 + $0x60] ss:$8 sps:$4 sm:$0xff]   ;;  %v951_v4 = vld [vmem:[%s1303_s1 + $0x54] ss:$8 sps:$4 sm:$0xff]   ;;  %s1311_s24 = smov (!%p220_p3, %s858_s24), 7  ;;  %vm408_vm0 = vcmask 588800  }
   0xd   : > { %423 = vmatpush1.bf16.msra.mxu0 %v947_v1  ;;  %v953_v5 = vld [vmem:[%s1303_s1 + $0x50] ss:$8 sps:$4 sm:$0xff]   ;;  %v954_v6 = vld [vmem:[%s1303_s1 + $0x44] ss:$8 sps:$4 sm:$0xff]   ;;  %s931_s10 = sshll.u32 %s1311_s24, 4  ;;  %vm415_vm1 = vcmask 1043456  }
   0xe   : > { %424 = vmatprep.subr.bf16.mxu0 %v948_v2  ;;  %v956_v7 = vld [vmem:[%s1303_s1 + $0x40] ss:$8 sps:$4 sm:$0xff]   ;;  %v957_v8 = vld [vmem:[%s1303_s1 + $0x34] ss:$8 sps:$4 sm:$0xff]   ;;  %s1118_s17 = scalar_lea.vmem %s1302_s0, %s931_s10  ;;  %v959_v9 = vld [vmem:[%s1303_s1 + $0x30] ss:$8 sps:$4 sm:$0xff]  }
   0xf   : > { %v960_v10 = vld [vmem:[%s1303_s1 + $0x24] ss:$8 sps:$4 sm:$0xff]   ;;  %v237_v12 = vld [vmem:[%s1118_s17 + $0x18] sm:$0xff]  ;;  %v962_v13 = vld [vmem:[%s1303_s1 + $0x20] ss:$8 sps:$4 sm:$0xff]   ;;  %vm789_vm2 = vcmask 588804  }
  0x10   : > { %v235_v11 = vld [vmem:[%s1118_s17 + $0x8] sm:$0xff]  ;;  %v963_v15 = vld [vmem:[%s1303_s1 + $0x14] ss:$8 sps:$4 sm:$0xff]   ;;  %v985_v17 = vld [vmem:[%s1305_s3 + $0x70] ss:$8 sps:$4 sm:$0xff]   ;;  %s932_s30 = sshll.u32 %s1311_s24, 3 }
  0x11   : > { %425 = vmatpush1.bf16.msra.mxu0 %v950_v3  ;;  %v243_v14 = vpack.c.bf16 %v237_v12, %v235_v11  ;;  %v983_v16 = vld [vmem:[%s1305_s3 + $0x74] ss:$8 sps:$4 sm:$0xff]   ;;  %v986_v18 = vld [vmem:[%s1305_s3 + $0x64] ss:$8 sps:$4 sm:$0xff]   ;;  %v965_v19 = vld [vmem:[%s1303_s1 + $0x10] ss:$8 sps:$4 sm:$0xff]   ;;  %s231_s8 = scalar_lea.vmem %s1307_s5, %s932_s30 }
  0x12   : > { %426 = vmatprep.subr.bf16.mxu0 %v951_v4  ;;  %712 = vmatprep.subr.bf16.mxu1 %v983_v16  ;;  %v988_v20 = vld [vmem:[%s1305_s3 + $0x60] ss:$8 sps:$4 sm:$0xff]   ;;  %v966_v21 = vld [vmem:[%s1303_s1 + $0x4] ss:$8 sps:$4 sm:$0xff]   ;;  %v989_v22 = vld [vmem:[%s1305_s3 + $0x54] ss:$8 sps:$4 sm:$0xff]  }
  0x13   : > { %891 = vmatprep.mubr.msk.bf16.mxu0 %vm408_vm0, %v243_v14  ;;  %713 = vmatpush1.bf16.msra.mxu1 %v985_v17  ;;  %v270_v23 = vld [vmem:[%s1303_s1 + $0xc0] sm:$0xff]  ;;  %v991_v25 = vld [vmem:[%s1305_s3 + $0x50] ss:$8 sps:$4 sm:$0xff]   ;;  %v971_v31 = vld [vmem:[%s1303_s1 + $0xb4] ss:$8 sps:$4 sm:$0xff]  }
  0x14   : > { %714 = vmatprep.subr.bf16.mxu1 %v986_v18  ;;  %v968_v24 = vld [vmem:[%s1303_s1] ss:$8 sps:$4 sm:$0xff]   ;;  %v889_v26 = vcombine.high %v270_v23, %v270_v23  ;;  %v888_v27 = vcombine.low %v270_v23, %v270_v23  ;;  %v992_v28 = vld [vmem:[%s1305_s3 + $0x44] ss:$8 sps:$4 sm:$0xff]   ;;  %v995_v32 = vld [vmem:[%s1305_s3 + $0x34] ss:$8 sps:$4 sm:$0xff]  }
  0x15   : > { %427 = vmatpush1.bf16.msra.mxu0 %v953_v5  ;;  %v994_v29 = vld [vmem:[%s1305_s3 + $0x40] ss:$8 sps:$4 sm:$0xff]   ;;  %v973_v33 = vld [vmem:[%s1303_s1 + $0xb0] ss:$8 sps:$4 sm:$0xff]   ;;  %v974_v35 = vld [vmem:[%s1303_s1 + $0xa4] ss:$8 sps:$4 sm:$0xff]  }
  0x16   : > { %428 = vmatprep.subr.bf16.mxu0 %v954_v6  ;;  %v417_v30 = vsel %vm415_vm1, %v888_v27, 0  ;;  %v997_v34 = vld [vmem:[%s1305_s3 + $0x30] ss:$8 sps:$4 sm:$0xff]   ;;  %v998_v36 = vld [vmem:[%s1305_s3 + $0x24] ss:$8 sps:$4 sm:$0xff]   ;;  %vm1284_vm3 = vmor %vm789_vm2, %vm415_vm1 }
  0x17   : > { %715 = vmatpush1.bf16.msra.mxu1 %v988_v20  ;;  %v976_v37 = vld [vmem:[%s1303_s1 + $0xa0] ss:$8 sps:$4 sm:$0xff]   ;;  %v977_v39 = vld [vmem:[%s1303_s1 + $0x94] ss:$8 sps:$4 sm:$0xff]   ;;  %v979_v41 = vld [vmem:[%s1303_s1 + $0x90] ss:$8 sps:$4 sm:$0xff]  }
  0x18   : > { %716 = vmatprep.subr.bf16.mxu1 %v989_v22  ;;  %v1000_v38 = vld [vmem:[%s1305_s3 + $0x20] ss:$8 sps:$4 sm:$0xff]   ;;  %v1001_v40 = vld [vmem:[%s1305_s3 + $0x14] ss:$8 sps:$4 sm:$0xff]   ;;  %v1003_v42 = vld [vmem:[%s1305_s3 + $0x10] ss:$8 sps:$4 sm:$0xff]  }
  0x19   : > { %429 = vmatpush1.bf16.msra.mxu0 %v956_v7  ;;  %v980_v43 = vld [vmem:[%s1303_s1 + $0x84] ss:$8 sps:$4 sm:$0xff]   ;;  %v982_v45 = vld [vmem:[%s1303_s1 + $0x80] ss:$8 sps:$4 sm:$0xff]   ;;  %v236_v47 = vld [vmem:[%s1118_s17 + $0x10] sm:$0xff] }
  0x1a   : > { %430 = vmatprep.subr.bf16.mxu0 %v957_v8  ;;  %v1004_v44 = vld [vmem:[%s1305_s3 + $0x4] ss:$8 sps:$4 sm:$0xff]   ;;  %v1006_v48 = vld [vmem:[%s1305_s3] ss:$8 sps:$4 sm:$0xff]   ;;  %v241_v50 = vld [vmem:[%s1118_s17 + $0x38] sm:$0xff]  ;;  %v273_v8 = vlaneseq }
  0x1b   : > { %717 = vmatpush1.bf16.msra.mxu1 %v991_v25  ;;  %v234_v46 = vld [vmem:[%s1118_s17] sm:$0xff]  ;;  %v239_v49 = vld [vmem:[%s1118_s17 + $0x28] sm:$0xff]  ;;  %v1007_v51 = vld [vmem:[%s1305_s3 + $0xf4] ss:$8 sps:$4 sm:$0xff]  }
  0x1c   : > { %718 = vmatprep.subr.bf16.mxu1 %v992_v28  ;;  %v242_v52 = vpack.c.bf16 %v236_v47, %v234_v46  ;;  %v245_v53 = vpack.c.bf16 %v241_v50, %v239_v49  ;;  %v1009_v54 = vld [vmem:[%s1305_s3 + $0xf0] ss:$8 sps:$4 sm:$0xff]   ;;  %v1010_v55 = vld [vmem:[%s1305_s3 + $0xe4] ss:$8 sps:$4 sm:$0xff]   ;;  %v1012_v58 = vld [vmem:[%s1305_s3 + $0xe0] ss:$8 sps:$4 sm:$0xff]  }
  0x1d   : > { %431 = vmatpush1.bf16.msra.mxu0 %v959_v9  ;;  %v238_v56 = vld [vmem:[%s1118_s17 + $0x20] sm:$0xff]  ;;  %v240_v57 = vld [vmem:[%s1118_s17 + $0x30] sm:$0xff]  ;;  %v274_v9 = vshrl.u32 %v273_v8, 7 }
  0x1e   : > { %432 = vmatprep.subr.bf16.mxu0 %v960_v10  ;;  %v244_v59 = vpack.c.bf16 %v240_v57, %v238_v56  ;;  %v1013_v60 = vld [vmem:[%s1305_s3 + $0xd4] ss:$8 sps:$4 sm:$0xff]   ;;  %v1015_v61 = vld [vmem:[%s1305_s3 + $0xd0] ss:$8 sps:$4 sm:$0xff]   ;;  %v1016_v62 = vld [vmem:[%s1305_s3 + $0xc4] ss:$8 sps:$4 sm:$0xff]  }
  0x1f   : > { %719 = vmatpush1.bf16.msra.mxu1 %v994_v29  ;;  %v1018_v63 = vld [vmem:[%s1305_s3 + $0xc0] ss:$8 sps:$4 sm:$0xff]   ;;  %v1019_v0 = vld [vmem:[%s1305_s3 + $0xb4] ss:$8 sps:$4 sm:$0xff]   ;;  %v1021_v1 = vld [vmem:[%s1305_s3 + $0xb0] ss:$8 sps:$4 sm:$0xff]  }
  0x20   : > { %720 = vmatprep.subr.bf16.mxu1 %v995_v32  ;;  %v1022_v2 = vld [vmem:[%s1305_s3 + $0xa4] ss:$8 sps:$4 sm:$0xff]   ;;  %v1024_v3 = vld [vmem:[%s1305_s3 + $0xa0] ss:$8 sps:$4 sm:$0xff]   ;;  %v1025_v4 = vld [vmem:[%s1305_s3 + $0x94] ss:$8 sps:$4 sm:$0xff]  }
  0x21   : > { %433 = vmatpush1.bf16.msra.mxu0 %v962_v13  ;;  %v1027_v5 = vld [vmem:[%s1305_s3 + $0x90] ss:$8 sps:$4 sm:$0xff]   ;;  %v1028_v6 = vld [vmem:[%s1305_s3 + $0x84] ss:$8 sps:$4 sm:$0xff]   ;;  %v1030_v7 = vld [vmem:[%s1305_s3 + $0x80] ss:$8 sps:$4 sm:$0xff]  }
  0x22   : > { %434 = vmatprep.subr.bf16.mxu0 %v963_v15  ;;  %v279_v10 = vsub.s32 1, %v274_v9  ;;  %v271_v11 = vld [vmem:[%s1304_s2] sm:$0x3]  ;;  %v275_v20 = vsub.s32 0, %v274_v9 }
  0x23   : > { %721 = vmatpush1.bf16.msra.mxu1 %v997_v34 }
  0x24   : > { %722 = vmatprep.subr.bf16.mxu1 %v998_v36  ;;  %v280_v13 = vrot.slane %v271_v11, %v279_v10 }
  0x25   : > { %435 = vmatpush1.bf16.msra.mxu0 %v965_v19 }
  0x26   : > { %436 = vmatprep.subr.bf16.mxu0 %v966_v21 }
  0x27   : > { %723 = vmatpush1.bf16.msra.mxu1 %v1000_v38 }
  0x28   : > { %724 = vmatprep.subr.bf16.mxu1 %v1001_v40 }
  0x29   : > { %437 = vmatpush1.bf16.msra.mxu0 %v968_v24  ;;  %v276_v24 = vrot.slane %v271_v11, %v275_v20 }
  0x2a   : > { %890 = vmatprep.subr.msk.bf16.mxu0 %vm415_vm1, %v889_v26 }
  0x2b   : > { %725 = vmatpush1.bf16.msra.mxu1 %v1003_v42 }
  0x2c   : > { %726 = vmatprep.subr.bf16.mxu1 %v1004_v44 }
  0x2d   : > { %445 = vmatpush2.bf16.msra.mxu0 %v417_v30 }
  0x2e   : > { %446 = vmatprep.subr.bf16.mxu0 %v971_v31 }
  0x2f   : > { %727 = vmatpush1.bf16.msra.mxu1 %v1006_v48 }
  0x30   : > { %728 = vmatprep.subr.bf16.mxu1 %v1007_v51 }
  0x31   : > { %447 = vmatpush2.bf16.msra.mxu0 %v973_v33 }
  0x32   : > { %448 = vmatprep.subr.bf16.mxu0 %v974_v35 }
  0x33   : > { %729 = vmatpush2.bf16.msra.mxu1 %v1009_v54 }
  0x34   : > { %730 = vmatprep.subr.bf16.mxu1 %v1010_v55 }
  0x35   : > { %449 = vmatpush2.bf16.msra.mxu0 %v976_v37 }
  0x36   : > { %450 = vmatprep.subr.bf16.mxu0 %v977_v39 }
  0x37   : > { %731 = vmatpush2.bf16.msra.mxu1 %v1012_v58 }
  0x38   : > { %732 = vmatprep.subr.bf16.mxu1 %v1013_v60 }
  0x39   : > { %451 = vmatpush2.bf16.msra.mxu0 %v979_v41 }
  0x3a   : > { %452 = vmatprep.subr.bf16.mxu0 %v980_v43  ;;  %v540_v43 = vld [vmem:[%s1306_s4] sm:$0x3] }
  0x3b   : > { %733 = vmatpush2.bf16.msra.mxu1 %v1015_v61  ;;  %v545_v44 = vrot.slane %v540_v43, %v275_v20 }
  0x3c   : > { %734 = vmatprep.subr.bf16.mxu1 %v1016_v62 }
  0x3d   : > { %453 = vmatpush2.bf16.msra.mxu0 %v982_v45  ;;  %v549_v45 = vrot.slane %v540_v43, %v279_v10 }
  0x3f   : > { %735 = vmatpush2.bf16.msra.mxu1 %v1018_v63 }
  0x40   : > { %455 = vmatmul.mubr.bf16.vlgmr.msra.gmra.mxu0 %v242_v52  ;;  %736 = vmatprep.subr.bf16.mxu1 %v1019_v0 }
  0x41   : > { %892 = vmatprep.mubr.msk.bf16.mxu0 %vm408_vm0, %v245_v53 }
  0x43   : > { %737 = vmatpush2.bf16.msra.mxu1 %v1021_v1 }
  0x44   : > { %738 = vmatprep.subr.bf16.mxu1 %v1022_v2 }
  0x47   : > { %739 = vmatpush2.bf16.msra.mxu1 %v1024_v3 }
  0x48   : > { %465 = vmatmul.mubr.bf16.gmra.mxu0 %v244_v59  ;;  %740 = vmatprep.subr.bf16.mxu1 %v1025_v4 }
  0x4b   : > { %741 = vmatpush2.bf16.msra.mxu1 %v1027_v5 }
  0x4c   : > { %742 = vmatprep.subr.bf16.mxu1 %v1028_v6 }
  0x4f   : > { %743 = vmatpush2.bf16.msra.mxu1 %v1030_v7 }
 0x100   : > { %v456_v12 = vpop.f32.mrf.mxu0 }
 0x101   : > { %v457_v28 = vadd.f32 %v456_v12, %v276_v24 }
 0x102   : > { %v458_v14 = vpop.f32.mrf.mxu0 }
 0x103   : > { %v459_v15 = vadd.f32 %v458_v14, %v280_v13  ;;  %v480_v32 = vmax.f32 %v457_v28, 0.0 }
 0x104   : > { %v460_v16 = vpop.f32.mrf.mxu0 }
 0x105   : > { %1031 = vtanh.f32 %v459_v15  ;;  %v461_v27 = vadd.f32 %v460_v16, %v276_v24 }
 0x106   : > { %v462_v17 = vpop.f32.mrf.mxu0 }
 0x107   : > { %v463_v18 = vadd.f32 %v462_v17, %v280_v13  ;;  %v482_v29 = vmax.f32 %v461_v27, 0.0 }
 0x108   : > { %v466_v19 = vpop.f32.mrf.mxu0 }
 0x109   : > { %1033 = vtanh.f32 %v463_v18  ;;  %v504_v34 = vpack.c.bf16 %v482_v29, %v480_v32  ;;  %v467_v36 = vadd.f32 %v466_v19, %v276_v24 }
 0x10a   : > { %v468_v21 = vpop.f32.mrf.mxu0 }
 0x10b   : > { %v469_v22 = vadd.f32 %v468_v21, %v280_v13  ;;  %v484_v40 = vmax.f32 %v467_v36, 0.0 }
 0x10c   : > { %v470_v23 = vpop.f32.mrf.mxu0 }
 0x10d   : > { %1035 = vtanh.f32 %v469_v22  ;;  %v471_v35 = vadd.f32 %v470_v23, %v276_v24 }
 0x10e   : > { %v472_v25 = vpop.f32.mrf.mxu0 }
 0x10f   : > { %v473_v26 = vadd.f32 %v472_v25, %v280_v13  ;;  %v486_v37 = vmax.f32 %v471_v35, 0.0 }
 0x111   : > { %1037 = vtanh.f32 %v473_v26  ;;  %v506_v42 = vpack.c.bf16 %v486_v37, %v484_v40 }
 0x112   : > { %v1032_v30 = vpop.eup %1031 }
 0x116   : > { %v1034_v31 = vpop.eup %1033 }
 0x117   : > { %v505_v33 = vpack.c.bf16 %v1034_v31, %v1032_v30 }
 0x119   : > { %744 = vmatprep.mubr.bf16.mxu1 %v505_v33 }
 0x11a   : > { %745 = vmatmul.mubr.bf16.vlgmr.msra.gmra.mxu1 %v504_v34  ;;  %v1036_v38 = vpop.eup %1035 }
 0x11e   : > { %v1038_v39 = vpop.eup %1037 }
 0x11f   : > { %v507_v41 = vpack.c.bf16 %v1038_v39, %v1036_v38 }
 0x121   : > { %754 = vmatprep.mubr.bf16.mxu1 %v507_v41 }
 0x122   : > { %755 = vmatmul.mubr.bf16.gmra.mxu1 %v506_v42 }
 0x1da   : > { %v746_v46 = vpop.f32.mrf.mxu1 }
 0x1db   : > { %v747_v48 = vadd.f32 %v746_v46, %v545_v44 }
 0x1dc   : > { %v748_v47 = vpop.f32.mrf.mxu1 }
 0x1dd   : > { %v749_v49 = vadd.f32 %v748_v47, %v549_v45 }
 0x1de   : > { %v750_v51 = vpop.f32.mrf.mxu1 }
 0x1df   : > { %v933_v52 = vpack.c.bf16 %v749_v49, %v747_v48  ;;  %v751_v54 = vadd.f32 %v750_v51, %v545_v44 }
 0x1e0   : > { %v752_v53 = vpop.f32.mrf.mxu1 }
 0x1e1   : > { %791 = vst.msk [vmem:[%s231_s8] sm:$0xff] %vm1284_vm3, %v933_v52  ;;  %v753_v55 = vadd.f32 %v752_v53, %v549_v45 }
 0x1e2   : > { %v756_v56 = vpop.f32.mrf.mxu1 }
 0x1e3   : > { %v934_v57 = vpack.c.bf16 %v753_v55, %v751_v54  ;;  %v757_v59 = vadd.f32 %v756_v56, %v545_v44 }
 0x1e4   : > { %v758_v58 = vpop.f32.mrf.mxu1 }
 0x1e5   : > { %792 = vst.msk [vmem:[%s231_s8 + $0x8] sm:$0xff] %vm1284_vm3, %v934_v57  ;;  %v759_v60 = vadd.f32 %v758_v58, %v549_v45 }
 0x1e6   : > { %v760_v61 = vpop.f32.mrf.mxu1 }
 0x1e7   : > { %v935_v62 = vpack.c.bf16 %v759_v60, %v757_v59  ;;  %v761_v0 = vadd.f32 %v760_v61, %v545_v44 }
 0x1e8   : > { %v762_v63 = vpop.f32.mrf.mxu1 }
 0x1e9   : > { %793 = vst.msk [vmem:[%s231_s8 + $0x10] sm:$0xff] %vm1284_vm3, %v935_v62  ;;  %v763_v1 = vadd.f32 %v762_v63, %v549_v45 }
 0x1eb   : > { %v936_v2 = vpack.c.bf16 %v763_v1, %v761_v0 }
 0x1ed   : > { %794 = vst.msk [vmem:[%s231_s8 + $0x18] sm:$0xff] %vm1284_vm3, %v936_v2 }
 0x1ee PF: > { %s15_s18 = sadd.s32 1, %s1045_s18  }
 0x1ef   : > { %p12_p4 = scmp.ge.s32.totalorder %s15_s18, 4  }
 0x1f1   :  { %14 = sbr.rel (!%p12_p4) target bundleno = 1 (0x1), region = 70 }

</bundles_post_ra>
